<compile_context>
chip_gen: v5e
topology: v5e:2x2
jax: 0.10.0
libtpu: 0.0.40
codegen_flags: <defaults>
</compile_context>

<pallas_src>
import functools

import numpy as np
import jax
import jax.numpy as jnp
from jax.experimental import pallas as pl
from jax.experimental.pallas import tpu as pltpu


def _basic_conv_kernel(x_hbm, w_ref, shift_ref, o_ref, xw_ref, dma_sem, *,
                       K, C_in, L_tile, W_cols, fuse_im2col):
    # x_hbm:     (N, C_in, L_pad)    full padded input, left in HBM (pl.ANY)
    # w_ref:     (C_out, K*C_in)     BN-scale-folded conv weight, VMEM resident
    # shift_ref: (C_out, 1)          folded BN shift = beta - mean * scale
    # o_ref:     (1, C_out, L_tile)  output tile (L on lanes -> lane-dense)
    # xw_ref:    (2, C_in, W_cols)   double-buffered input window (incl. halo)
    # dma_sem:   (2,)                DMA semaphores (one per buffer slot)
    n = pl.program_id(0)
    j = pl.program_id(1)
    num_l = pl.num_programs(1)

    def window_copy(jj, slot):
        start = pl.multiple_of(jj * L_tile, 128)
        return pltpu.make_async_copy(
            x_hbm.at[n, :, pl.ds(start, W_cols)],
            xw_ref.at[slot],
            dma_sem.at[slot])

    slot = j & 1

    # Prime the double buffer at the start of each batch row.  Safe because the
    # L axis is "arbitrary": steps along j for a fixed n run in order on one
    # core.
    @pl.when(j == 0)
    def _():
        window_copy(j, slot).start()

    # Prefetch the NEXT tile's window before waiting on the current one, so the
    # HBM fetch overlaps this step's MXU/VPU work.
    @pl.when(j + 1 < num_l)
    def _():
        window_copy(j + 1, 1 - slot).start()

    # Wait for the current tile's window.
    window_copy(j, slot).wait()

    xw = xw_ref[slot]                      # (C_in, W_cols)

    if fuse_im2col:
        # im2col (K*C_in, L_tile) -> ONE MXU matmul with contraction K*C_in.
        # Preferred on v6e/v7x (2 vst slots, 256^2 MXU).
        if K > 1:
            cols = jnp.concatenate([xw[:, k:k + L_tile] for k in range(K)],
                                   axis=0)
        else:
            cols = xw[:, :L_tile]
        acc = jnp.dot(w_ref[...], cols, preferred_element_type=jnp.float32)
    else:
        # K accumulating matmuls on shifted slices; avoids materializing the
        # (K*C_in, L_tile) im2col temp (preferred on v5e: 1 vector-store slot).
        w_all = w_ref[...]
        acc = jnp.dot(w_all[:, :C_in], xw[:, :L_tile],
                      preferred_element_type=jnp.float32)
        for k in range(1, K):
            acc = acc + jnp.dot(w_all[:, k * C_in:(k + 1) * C_in],
                                xw[:, k:k + L_tile],
                                preferred_element_type=jnp.float32)

    # BN scale already folded into the weights; remaining epilogue is
    # '+ shift' and ReLU, f32 on the VPU.
    o_ref[0] = jnp.maximum(acc + shift_ref[...], 0.0).astype(o_ref.dtype)


def basic_conv(x, weight, gamma, beta, running_mean, running_var, *,
               kernel_size, eps=1e-5, padding="same",
               compute_dtype=jnp.bfloat16, out_dtype=jnp.float32,
               l_tile=None, fuse_im2col=True):
    """x: (N, C_in, L), PyTorch NCW layout.  Returns (N, C_out, L_out)."""
    N, C_in, L = x.shape
    C_out = weight.shape[0]
    K = int(kernel_size)

    # --- PyTorch module padding convention (ConstantPad1d + unpadded Conv1d) --
    if K == 1:
        lp, rp = 0, 0
    else:
        lp = int(K / 2)
        rp = int(np.ceil(K / 2)) - 1
    if padding == "same":
        L_out = L
    else:                                   # no pad -> 'valid' conv
        L_out = L - K + 1
        lp, rp = 0, 0
    assert L_out >= 1

    halo = K - 1
    halo_pad = (-(-halo // 128) * 128) if halo > 0 else 0   # 128-aligned halo

    # --- per-generation VMEM budget & tile selection --------------------------
    lt_cap = -(-L_out // 128) * 128          # L_out rounded up to 128 multiple
    try:
        info = pltpu.get_tpu_info()
        vmem_cap = int(getattr(info, "vmem_capacity_bytes", 64 * 1024 * 1024))
    except Exception:
        vmem_cap = 64 * 1024 * 1024          # conservative (v7x-sized) fallback
    # Leave >=16 MiB headroom; cap at 96 MiB on 128 MiB parts (v5e/v6e),
    # which lands at ~48 MiB on v7x's 64 MiB VMEM.
    vmem_limit = int(min(max(vmem_cap - 16 * 1024 * 1024, 32 * 1024 * 1024),
                         96 * 1024 * 1024))

    if l_tile is None:
        dsz = jnp.dtype(compute_dtype).itemsize
        osz = jnp.dtype(out_dtype).itemsize
        budget = vmem_limit // 2             # headroom for pipeline bookkeeping
        cin_p = max(8, -(-C_in // 8) * 8)    # sublane-padded channel counts
        cout_p = max(8, -(-C_out // 8) * 8)
        best = 128
        lt = 128
        while lt <= min(lt_cap, 8192):
            need = (cout_p * K * cin_p * dsz                 # resident weights
                    + cout_p * 4                             # BN shift
                    + 2 * cout_p * lt * osz                  # output blocks (x2)
                    + 2 * cin_p * (lt + halo_pad) * dsz      # halo windows (x2)
                    + 2 * K * cin_p * lt * dsz               # im2col temp+slack
                    + cout_p * lt * 4)                       # f32 accumulator
            if need <= budget:
                best = lt
            lt += 128
        l_tile = best
    else:
        l_tile = max(128, -(-int(l_tile) // 128) * 128)      # force 128 multiple
    l_tile = min(l_tile, lt_cap)

    num_l = -(-L_out // l_tile)
    L_out_p = num_l * l_tile
    w_cols = l_tile + halo_pad               # 128-aligned DMA window width

    # Pad x once so every tile's window [j*l_tile, j*l_tile + w_cols) is
    # in bounds (covers conv 'same' pad + output rounding + halo alignment).
    total_cols = L_out_p + (w_cols - l_tile)
    right = total_cols - (lp + L)
    x_pad = jnp.pad(x, ((0, 0), (0, 0), (lp, right))).astype(compute_dtype)

    # --- BN (inference) folded: scale goes into the weights (in f32) ----------
    scale = gamma / jnp.sqrt(running_var + eps)
    shift = (beta - running_mean * scale).astype(jnp.float32).reshape(C_out, 1)
    # weight (C_out, C_in, K) -> (C_out, K*C_in) matching the in-kernel im2col
    # ordering im2col[k*C_in + ci, l] = x_pad[ci, l + k]; fold scale BEFORE the
    # compute_dtype cast to avoid compounding quantization error.
    w2 = jnp.transpose(weight, (0, 2, 1)).reshape(C_out, K * C_in)
    w2 = (w2 * scale[:, None]).astype(compute_dtype)

    kernel = functools.partial(_basic_conv_kernel, K=K, C_in=C_in,
                               L_tile=l_tile, W_cols=w_cols,
                               fuse_im2col=fuse_im2col)

    out = pl.pallas_call(
        kernel,
        out_shape=jax.ShapeDtypeStruct((N, C_out, L_out_p), out_dtype),
        grid_spec=pltpu.PrefetchScalarGridSpec(
            num_scalar_prefetch=0,
            grid=(N, num_l),
            in_specs=[
                pl.BlockSpec(memory_space=pl.ANY),                     # x in HBM
                pl.BlockSpec((C_out, K * C_in), lambda n, j: (0, 0)),  # weights
                pl.BlockSpec((C_out, 1), lambda n, j: (0, 0)),         # BN shift
            ],
            out_specs=pl.BlockSpec((1, C_out, l_tile), lambda n, j: (n, 0, j)),
            scratch_shapes=[
                pltpu.VMEM((2, C_in, w_cols), compute_dtype),  # dbl-buf window
                pltpu.SemaphoreType.DMA((2,)),
            ],
        ),
        compiler_params=pltpu.CompilerParams(
            # L axis carries the double-buffer state across steps -> arbitrary;
            # batch axis is parallel (megacore sharding).
            dimension_semantics=("parallel", "arbitrary"),
            vmem_limit_bytes=vmem_limit,
        ),
    )(x_pad, w2, shift)

    if L_out_p != L_out:
        out = out[:, :, :L_out]
    return out


def _reference(x, weight, gamma, beta, mean, var, *, kernel_size, eps=1e-5,
               padding="same"):
    """Pure-JAX reference of the PyTorch forward (BN in inference form)."""
    K = kernel_size
    lpad = 0 if K == 1 else int(K / 2)
    rpad = 0 if K == 1 else int(np.ceil(K / 2)) - 1
    if padding == "same":
        x = jnp.pad(x, ((0, 0), (0, 0), (lpad, rpad)))
    y = jax.lax.conv_general_dilated(
        x, weight, window_strides=(1,), padding="VALID",
        dimension_numbers=("NCH", "OIH", "NCH"))
    y = (y - mean[None, :, None]) / jnp.sqrt(var[None, :, None] + eps)
    y = y * gamma[None, :, None] + beta[None, :, None]
    return jnp.maximum(y, 0.0)


if __name__ == "__main__":
    # Small shapes consistent with BasicConv: batch=2, in_ch=4, out_ch=8, L=16, k=3
    N, C_in, C_out, L, K = 2, 4, 8, 16, 3

    key = jax.random.PRNGKey(0)
    k1, k2, k3, k4, k5, k6 = jax.random.split(key, 6)
    x = jax.random.normal(k1, (N, C_in, L), dtype=jnp.float32)
    weight = jax.random.normal(k2, (C_out, C_in, K), dtype=jnp.float32) * 0.1
    gamma = 1.0 + 0.1 * jax.random.normal(k3, (C_out,), dtype=jnp.float32)
    beta = 0.1 * jax.random.normal(k4, (C_out,), dtype=jnp.float32)
    running_mean = 0.1 * jax.random.normal(k5, (C_out,), dtype=jnp.float32)
    running_var = jnp.abs(1.0 + 0.1 * jax.random.normal(k6, (C_out,), dtype=jnp.float32))

    ref = _reference(x, weight, gamma, beta, running_mean, running_var,
                     kernel_size=K)

    # 1) f32, fused single-matmul im2col path (v6e/v7x structure) — tight check.
    out_f32 = jax.block_until_ready(
        basic_conv(x, weight, gamma, beta, running_mean, running_var,
                   kernel_size=K, compute_dtype=jnp.float32,
                   out_dtype=jnp.float32, fuse_im2col=True))
    np.testing.assert_allclose(np.asarray(out_f32), np.asarray(ref),
                               rtol=1e-5, atol=1e-5)

    # 2) f32, K accumulating-matmul path (v5e-friendly) — tight check.
    out_kloop = jax.block_until_ready(
        basic_conv(x, weight, gamma, beta, running_mean, running_var,
                   kernel_size=K, compute_dtype=jnp.float32,
                   out_dtype=jnp.float32, fuse_im2col=False))
    np.testing.assert_allclose(np.asarray(out_kloop), np.asarray(ref),
                               rtol=1e-5, atol=1e-5)

    # 3) bf16 inputs/weights + bf16 output, f32 accumulation — relaxed check.
    out_bf16 = jax.block_until_ready(
        basic_conv(x, weight, gamma, beta, running_mean, running_var,
                   kernel_size=K, compute_dtype=jnp.bfloat16,
                   out_dtype=jnp.bfloat16, fuse_im2col=True))
    np.testing.assert_allclose(np.asarray(out_bf16.astype(jnp.float32)),
                               np.asarray(ref), rtol=5e-2, atol=5e-2)

    print("KERNEL_OK")
</pallas_src>

<mosaic_0001>
module attributes {stable_mosaic.version = 11 : i64} {
  func.func @_basic_conv_kernel(%arg0: i32, %arg1: i32, %arg2: memref<2x4x256xf32, #tpu.memory_space<any>>, %arg3: memref<8x12xf32, #tpu.memory_space<vmem>>, %arg4: memref<8x1xf32, #tpu.memory_space<vmem>>, %arg5: memref<1x8x128xf32, #tpu.memory_space<vmem>>, %arg6: memref<2x4x256xf32, #tpu.memory_space<vmem>>, %arg7: memref<2x!tpu.dma_semaphore, #tpu.memory_space<semaphore_mem>>) attributes {dimension_semantics = [#tpu.dimension_semantics<parallel>, #tpu.dimension_semantics<arbitrary>], iteration_bounds = array<i64: 2, 1>, scalar_prefetch = 0 : i64, scratch_operands = 2 : i64, tpu.core_type = #tpu.core_type<tc>, window_params = [{}, {pipeline_mode = #tpu.pipeline_mode<synchronous>, transform_indices = @transform_1, window_bounds = array<i64: 8, 12>}, {pipeline_mode = #tpu.pipeline_mode<synchronous>, transform_indices = @transform_2, window_bounds = array<i64: 8, 1>}, {transform_indices = @transform_3, window_bounds = array<i64: 1, 8, 128>}]} {
    %c1_i32 = arith.constant 1 : i32
    %0 = arith.andi %arg1, %c1_i32 : i32
    %c0_i32 = arith.constant 0 : i32
    %1 = arith.cmpi eq, %arg1, %c0_i32 : i32
    %2 = arith.extui %1 : i1 to i32
    %c0_i32_0 = arith.constant 0 : i32
    %3 = arith.cmpi ne, %2, %c0_i32_0 : i32
    scf.if %3 {
      %c128_i32_16 = arith.constant 128 : i32
      %33 = arith.muli %arg1, %c128_i32_16 : i32
      %34 = tpu.assume_multiple %33, 128 : i32
      %c0_i32_17 = arith.constant 0 : i32
      %35 = tpu.memref_slice %arg2[%arg0, %c0_i32_17, %34] : memref<2x4x256xf32, #tpu.memory_space<any>> -> memref<1x4x256xf32, #tpu.memory_space<any>>
      %36 = tpu.memref_squeeze %35 : memref<1x4x256xf32, #tpu.memory_space<any>> -> memref<4x256xf32, #tpu.memory_space<any>>
      %c0_i32_18 = arith.constant 0 : i32
      %c0_i32_19 = arith.constant 0 : i32
      %37 = tpu.memref_slice %arg6[%0, %c0_i32_18, %c0_i32_19] : memref<2x4x256xf32, #tpu.memory_space<vmem>> -> memref<1x4x256xf32, #tpu.memory_space<vmem>>
      %38 = tpu.memref_squeeze %37 : memref<1x4x256xf32, #tpu.memory_space<vmem>> -> memref<4x256xf32, #tpu.memory_space<vmem>>
      %39 = tpu.memref_slice %arg7[%0] : memref<2x!tpu.dma_semaphore, #tpu.memory_space<semaphore_mem>> -> memref<1x!tpu.dma_semaphore, #tpu.memory_space<semaphore_mem>>
      %40 = tpu.memref_squeeze %39 : memref<1x!tpu.dma_semaphore, #tpu.memory_space<semaphore_mem>> -> memref<!tpu.dma_semaphore, #tpu.memory_space<semaphore_mem>>
      tpu.enqueue_dma source(%36 : memref<4x256xf32, #tpu.memory_space<any>>) target(%38 : memref<4x256xf32, #tpu.memory_space<vmem>>) target_semaphore(%40 : memref<!tpu.dma_semaphore, #tpu.memory_space<semaphore_mem>>)
    } else {
    }
    %c1_i32_1 = arith.constant 1 : i32
    %4 = arith.addi %arg1, %c1_i32_1 : i32
    %c1_i32_2 = arith.constant 1 : i32
    %5 = arith.cmpi slt, %4, %c1_i32_2 : i32
    %6 = arith.extui %5 : i1 to i32
    %c0_i32_3 = arith.constant 0 : i32
    %7 = arith.cmpi ne, %6, %c0_i32_3 : i32
    scf.if %7 {
      %c1_i32_16 = arith.constant 1 : i32
      %33 = arith.addi %arg1, %c1_i32_16 : i32
      %c1_i32_17 = arith.constant 1 : i32
      %34 = arith.subi %c1_i32_17, %0 : i32
      %c128_i32_18 = arith.constant 128 : i32
      %35 = arith.muli %33, %c128_i32_18 : i32
      %36 = tpu.assume_multiple %35, 128 : i32
      %c0_i32_19 = arith.constant 0 : i32
      %37 = tpu.memref_slice %arg2[%arg0, %c0_i32_19, %36] : memref<2x4x256xf32, #tpu.memory_space<any>> -> memref<1x4x256xf32, #tpu.memory_space<any>>
      %38 = tpu.memref_squeeze %37 : memref<1x4x256xf32, #tpu.memory_space<any>> -> memref<4x256xf32, #tpu.memory_space<any>>
      %c0_i32_20 = arith.constant 0 : i32
      %c0_i32_21 = arith.constant 0 : i32
      %39 = tpu.memref_slice %arg6[%34, %c0_i32_20, %c0_i32_21] : memref<2x4x256xf32, #tpu.memory_space<vmem>> -> memref<1x4x256xf32, #tpu.memory_space<vmem>>
      %40 = tpu.memref_squeeze %39 : memref<1x4x256xf32, #tpu.memory_space<vmem>> -> memref<4x256xf32, #tpu.memory_space<vmem>>
      %41 = tpu.memref_slice %arg7[%34] : memref<2x!tpu.dma_semaphore, #tpu.memory_space<semaphore_mem>> -> memref<1x!tpu.dma_semaphore, #tpu.memory_space<semaphore_mem>>
      %42 = tpu.memref_squeeze %41 : memref<1x!tpu.dma_semaphore, #tpu.memory_space<semaphore_mem>> -> memref<!tpu.dma_semaphore, #tpu.memory_space<semaphore_mem>>
      tpu.enqueue_dma source(%38 : memref<4x256xf32, #tpu.memory_space<any>>) target(%40 : memref<4x256xf32, #tpu.memory_space<vmem>>) target_semaphore(%42 : memref<!tpu.dma_semaphore, #tpu.memory_space<semaphore_mem>>)
    } else {
    }
    %c128_i32 = arith.constant 128 : i32
    %8 = arith.muli %arg1, %c128_i32 : i32
    %9 = tpu.assume_multiple %8, 128 : i32
    %c0_i32_4 = arith.constant 0 : i32
    %10 = tpu.memref_slice %arg2[%arg0, %c0_i32_4, %9] : memref<2x4x256xf32, #tpu.memory_space<any>> -> memref<1x4x256xf32, #tpu.memory_space<any>>
    %11 = tpu.memref_squeeze %10 : memref<1x4x256xf32, #tpu.memory_space<any>> -> memref<4x256xf32, #tpu.memory_space<any>>
    %c0_i32_5 = arith.constant 0 : i32
    %c0_i32_6 = arith.constant 0 : i32
    %12 = tpu.memref_slice %arg6[%0, %c0_i32_5, %c0_i32_6] : memref<2x4x256xf32, #tpu.memory_space<vmem>> -> memref<1x4x256xf32, #tpu.memory_space<vmem>>
    %13 = tpu.memref_squeeze %12 : memref<1x4x256xf32, #tpu.memory_space<vmem>> -> memref<4x256xf32, #tpu.memory_space<vmem>>
    %14 = tpu.memref_slice %arg7[%0] : memref<2x!tpu.dma_semaphore, #tpu.memory_space<semaphore_mem>> -> memref<1x!tpu.dma_semaphore, #tpu.memory_space<semaphore_mem>>
    %15 = tpu.memref_squeeze %14 : memref<1x!tpu.dma_semaphore, #tpu.memory_space<semaphore_mem>> -> memref<!tpu.dma_semaphore, #tpu.memory_space<semaphore_mem>>
    tpu.wait_dma2 semaphore(%15 : memref<!tpu.dma_semaphore, #tpu.memory_space<semaphore_mem>>) src(%11 : memref<4x256xf32, #tpu.memory_space<any>>) dst(%13 : memref<4x256xf32, #tpu.memory_space<vmem>>)
    %16 = arith.index_cast %0 : i32 to index
    %c0 = arith.constant 0 : index
    %c0_7 = arith.constant 0 : index
    %17 = vector.load %arg6[%16, %c0, %c0_7] : memref<2x4x256xf32, #tpu.memory_space<vmem>>, vector<1x4x256xf32>
    %18 = vector.shape_cast %17 : vector<1x4x256xf32> to vector<4x256xf32>
    %19 = vector.extract_strided_slice %18 {offsets = [0, 0], sizes = [4, 128], strides = [1, 1]} : vector<4x256xf32> to vector<4x128xf32>
    %20 = vector.extract_strided_slice %18 {offsets = [0, 1], sizes = [4, 128], strides = [1, 1]} : vector<4x256xf32> to vector<4x128xf32>
    %21 = vector.extract_strided_slice %18 {offsets = [0, 2], sizes = [4, 128], strides = [1, 1]} : vector<4x256xf32> to vector<4x128xf32>
    %22 = tpu.concatenate %19, %20, %21 in 0 : vector<4x128xf32>, vector<4x128xf32>, vector<4x128xf32> -> vector<12x128xf32>
    %c0_8 = arith.constant 0 : index
    %c0_9 = arith.constant 0 : index
    %23 = vector.load %arg3[%c0_8, %c0_9] : memref<8x12xf32, #tpu.memory_space<vmem>>, vector<8x12xf32>
    %cst = arith.constant dense<0.000000e+00> : vector<8x128xf32>
    %24 = tpu.matmul %23, %22, %cst {dimension_numbers = #tpu.dot_dimension_numbers<[1], [0], [0], [1], [0, 0, 1, 1], [], []>} : vector<8x12xf32>, vector<12x128xf32>, vector<8x128xf32> -> vector<8x128xf32>
    %c0_10 = arith.constant 0 : index
    %c0_11 = arith.constant 0 : index
    %25 = vector.load %arg4[%c0_10, %c0_11] : memref<8x1xf32, #tpu.memory_space<vmem>>, vector<8x1xf32>
    %26 = vector.broadcast %25 : vector<8x1xf32> to vector<8x128xf32>
    %27 = arith.addf %24, %26 : vector<8x128xf32>
    %cst_12 = arith.constant 0.000000e+00 : f32
    %28 = vector.broadcast %cst_12 : f32 to vector<8x128xf32>
    %29 = arith.maximumf %27, %28 : vector<8x128xf32>
    %c0_13 = arith.constant 0 : index
    %c0_14 = arith.constant 0 : index
    %c0_15 = arith.constant 0 : index
    %30 = vector.load %arg5[%c0_13, %c0_14, %c0_15] : memref<1x8x128xf32, #tpu.memory_space<vmem>>, vector<1x8x128xf32>
    %31 = vector.shape_cast %30 : vector<1x8x128xf32> to vector<8x128xf32>
    %32 = vector.shape_cast %29 : vector<8x128xf32> to vector<1x8x128xf32>
    tpu.vector_store %arg5[%c0_13, %c0_14, %c0_15], %32 {strides = array<i32>} : memref<1x8x128xf32, #tpu.memory_space<vmem>>, vector<1x8x128xf32>,
    return
  }
  func.func @transform_1(%arg0: i32, %arg1: i32) -> (i32, i32) {
    %c0_i32 = arith.constant 0 : i32
    %c0_i32_0 = arith.constant 0 : i32
    %c0_i32_1 = arith.constant 0 : i32
    return %c0_i32, %c0_i32_0 : i32, i32
  }
  func.func @transform_2(%arg0: i32, %arg1: i32) -> (i32, i32) {
    %c0_i32 = arith.constant 0 : i32
    %c0_i32_0 = arith.constant 0 : i32
    %c0_i32_1 = arith.constant 0 : i32
    return %c0_i32, %c0_i32_0 : i32, i32
  }
  func.func @transform_3(%arg0: i32, %arg1: i32) -> (i32, i32, i32) {
    %c0_i32 = arith.constant 0 : i32
    %c0_i32_0 = arith.constant 0 : i32
    return %arg0, %c0_i32, %arg1 : i32, i32, i32
  }
}

</mosaic_0001>

<bundles_post_ra>
// kernel: tpu_custom_call.1
= control target key start
LH: loop header
LB: loop body
LE: loop exit
PB: predicated region body
PF: predicated region fallthrough
CT: control target
= control target key end

     0   :  { %8 = vsyncpa [#allocation5], 0  ;;  %s705_s0 = inlined_call_operand.hbm [shape: f32[2,4,256], index: 0, kind: input, shape index: {}]   ;;  %s706_s1 = inlined_call_operand.vmem [shape: f32[8,12], index: 1, kind: input, shape index: {}]   ;;  %s707_s2 = inlined_call_operand.vmem [shape: f32[8,1], index: 2, kind: input, shape index: {}]   ;;  %s708_s3 = inlined_call_operand.hbm [shape: f32[2,8,128], index: 3, kind: output, shape index: {}]  }
   0x1   :  { %10 = vsyncpa [#allocation5 + $0x1], 0  ;;  %s583_s12 = smov 0   ;;  %s585_s13 = smov 0  }
   0x2   :  { %s587_s14 = smov 0   ;;  %s589_s15 = smov 0  }
   0x3   :  { %s591_s16 = smov 0   ;;  %s593_s17 = smov 0  }
   0x4 LB: > { %s367_s18 = sadd.s32 4294967295, %s557_s17   ;;  %s368_s19 = sadd.s32 4294967294, %s557_s17   ;;  %s557_s17 = sphi %s593_s17, %s16_s17   ;;  %s553_s16 = sphi %s591_s16, %s715_s16   ;;  %s549_s15 = sphi %s589_s15, %s714_s15   ;;  %s545_s14 = sphi %s587_s14, %s713_s14   ;;  %s541_s13 = sphi %s585_s13, %s712_s13   ;;  %s537_s12 = sphi %s583_s12, %s711_s12  }
   0x5   : > { %s28_s20 = sadd.s32 1, %s553_s16  ;;  %s79_s21 = sadd.s32 1, %s545_s14 }
   0x6   : > { %p30_p0 = scmp.ge.s32.totalorder %s28_s20, 2  ;;  %p89_p1 = scmp.ne.s32.totalorder %s545_s14, %s541_s13 }
   0x7   : > { %p90_p2 = scmp.eq.s32.totalorder %s367_s18, 1  ;;  %p95_p3 = scmp.ne.s32.totalorder %s541_s13, %s537_s12 }
   0x8   : > { %s717_s20 = smov (%p30_p0, %s28_s20), 0  ;;  %p96_p5 = scmp.eq.s32.totalorder %s368_s19, 1 }
   0x9   : > { %p623_p4 = por %p90_p2, %p89_p1  ;;  %s74_s23 = ssub.s32 %s553_s16, %s717_s20 }
   0xa   : > { %p370_p6 = scmp.ge.s32.totalorder %s557_s17, 1  ;;  %p77_p7 = scmp.eq.s32.totalorder %s74_s23, 0 }
   0xb   : > { %p630_p8 = por %p96_p5, %p95_p3  ;;  %p120_p9 = scmp.lt.s32.totalorder %s557_s17, 3 }
   0xc   : > { %s636_s25 = scalar_select %p77_p7, %s545_s14, %s79_s21  }
   0xd   : > { %p121_p10 = pnand %p370_p6, %p120_p9 }
   0xe   : > { %s134_s26 = sand.u32 (!%p121_p10), 1, %s541_s13   ;;  %s384_s27 = sshll.u32 (!%p121_p10), %s549_s15, 3 }
   0xf   : > { %124 = sbr.rel (%p121_p10) target bundleno = 307 (0x133), region = 28  ;;  %s642_s28 = sshll.u32 (!%p121_p10), %s134_s26, 3 }
  0x10   : > { %s148_s4 = scalar_lea.hbm (!%p121_p10), %s705_s0, %s384_s27  ;;  %s559_s6 = smov (!%p121_p10), [#allocation2]  }
  0x11   : > { %s160_s5 = sshll.u32 (!%p121_p10), %s148_s4, 4  ;;  %s162_s7 = sshll.u32 (!%p121_p10), %s559_s6, 4  ;;  %s161_s5 = int_to_ptr.hbm [resolvable:$true] %s160_s5  ;;  %s163_s7 = int_to_ptr.vmem [resolvable:$true] %s162_s7 }
  0x12   : > { %s453_s8 = sshra.s32 (!%p121_p10), %s161_s5, 4  ;;  %s457_s18 = scalar_lea.hbm (!%p121_p10), %s705_s0, 16  ;;  %s454_s8 = int_to_ptr.hbm [resolvable:$true] %s453_s8 }
  0x13   : > { %s455_s9 = scalar_lea.hbm (!%p121_p10), %s454_s8, 8  ;;  %p458_p12 = scmp.lt.s32.totalorder (!%p121_p10), %s454_s8, %s705_s0 }
  0x14   : > { %p456_p11 = scmp.ne.s32.totalorder %s454_s8, %s455_s9  ;;  %p459_p13 = scmp.lt.s32.totalorder %s457_s18, %s455_s9 }
  0x16   : > { %p460_p0 = por %p459_p13, %p458_p12 }
  0x18   : > { %p461_p1 = pnand %p460_p0, %p456_p11 }
  0x1a   : > { %464 = shalt.err (!%p461_p1)  }
  0x1b   : > { %165 = dma.hbm_to_vmem [thread:$0]  %s161_s5, 128, %s163_s7, [#allocation3] }
  0x1c   : > { %s136_s23 = scalar_lea.vmem [#allocation4], %s642_s28 }
  0x1d   : > { %529 = dma.done.wait [#allocation3], 128 }
  0x1e   : > { %530 = vsyncadd [#allocation3], 4294967168  ;;  %v205_v0 = vld [vmem:[#allocation2] sm:$0xff]  ;;  %s560_s29 = smov 127   ;;  %s561_s30 = smov 126   ;;  %v230_v6 = vld [vmem:[%s707_s2] sm:$0xff] }
  0x1f   : > { %208 = vst [vmem:[#allocation1 + $0x1] ss:$2 sm:$0xff] %v205_v0  ;;  %v562_v7 = vmov 0   ;;  %vm215_vm0 = vcmask 1039360   ;;  %vm225_vm1 = vcmask 1031168   ;;  %vm227_vm2 = vcmask 1043456   ;;  %s276_s10 = scalar_lea.hbm %s708_s3, %s384_s27 }
  0x20   : > { %451 = vset.pattern.permute.xlu1 %v562_v7  ;;  %452 = vset.pattern.permute.xlu0 %v562_v7  ;;  %v229_v16 = vld [vmem:[%s706_s1] sm:$0xff]  ;;  %vm236_vm3 = vcmask 97280   ;;  %s278_s11 = sshll.u32 %s136_s23, 4  ;;  %s280_s18 = sshll.u32 %s276_s10, 4  ;;  %s279_s11 = int_to_ptr.vmem [resolvable:$true] %s278_s11  ;;  %s281_s18 = int_to_ptr.hbm [resolvable:$true] %s280_s18 }
  0x21   : > { %s265_s19 = scalar_lea.sflag [#allocation5], %s134_s26  ;;  %s491_s21 = sshra.s32 %s281_s18, 4  ;;  %s492_s21 = int_to_ptr.hbm [resolvable:$true] %s491_s21 }
  0x22   : > { %s493_s15 = scalar_lea.hbm %s492_s21, 8  ;;  %p498_p6 = scmp.lt.s32.totalorder %s492_s21, %s708_s3 }
  0x23   : > { %p494_p2 = scmp.ne.s32.totalorder %s492_s21, %s493_s15 }
  0x25   : > { %p495_p3 = pnand %p494_p2, %p623_p4 }
  0x26   : > { %v209_v1 = vld.sshfl [vmem:[#allocation1] sm:$0xff pattern:$0x75316420]  ;;  %v210_v2 = vld.sshfl [vmem:[#allocation1 + $0x8] sm:$0xff pattern:$0x75316420] }
  0x27   : > { %218 = vst [vmem:[#allocation1] ss:$2 sm:$0xff] %v205_v0  ;;  %v446_v3 = vpack.i.bf16 %v210_v2, %v209_v1  ;;  %p496_p5 = pneg %p495_p3 }
  0x29   : > { %447 = vrot.lane.b32.xlu1 %v446_v3, %s560_s29 }
  0x2e   : > { %v219_v4 = vld.sshfl [vmem:[#allocation1] sm:$0xff pattern:$0x75316420]  ;;  %v220_v5 = vld.sshfl [vmem:[#allocation1 + $0x8] sm:$0xff pattern:$0x75316420] }
  0x2f   : > { %221 = vrot.lane.b32.xlu0 %v219_v4, %s561_s30 }
  0x31   : > { %233 = vperm.xlu1 %451, %v230_v6  }
  0x37   : > { %223 = vrot.lane.b32.xlu0 %v220_v5, %s561_s30  ;;  %s497_s30 = scalar_lea.hbm %s708_s3, 16 }
  0x38   : > { %p499_p7 = scmp.lt.s32.totalorder %s497_s30, %s493_s15 }
  0x3a   : > { %p500_p9 = por %p499_p7, %p498_p6 }
  0x3c   : > { %p501_p10 = pnand %p500_p9, %p496_p5 }
  0x9b   : > { %v448_v8 = vpop.permute.xlu1 %447 }
  0x9c   : > { %v450_v10 = vunpack.i.h.bf16 %v448_v8  ;;  %v449_v11 = vunpack.i.l.bf16 %v448_v8 }
  0x9e   : > { %v216_v12 = vsel %vm215_vm0, %v449_v11, %v450_v10 }
  0x9f   : > { %v228_v15 = vsel %vm227_vm2, %v205_v0, %v216_v12 }
  0xa1   : > { %v222_v9 = vpop.permute.xlu0 %221 }
  0xa3   : > { %v234_v17 = vpop.permute.xlu1 %233 }
  0xa9   : > { %v224_v13 = vpop.permute.xlu0 %223 }
  0xaa   : > { %v226_v14 = vsel %vm225_vm1, %v222_v9, %v224_v13 }
  0xab   : > { %376 = vmatpush.msk.msra.mxu0 %vm227_vm2, %v226_v14 }
  0xad   : > { %257 = vmatpush.msra.mxu0 %v228_v15 }
  0xae   : > { %377 = vmatmul.msk.f32.vlgmr.msra.gmra.mxu0 %vm236_vm3, %v229_v16 }
 0x12b   : > { %v259_v18 = vpop.f32.mrf.mxu0 }
 0x12c   : > { %v260_v19 = vadd.f32 %v259_v18, %v234_v17 }
 0x12e   : > { %v262_v20 = vmax.f32 %v260_v19, 0.0 }
 0x130   : > { %263 = vst [vmem:[%s136_s23] sm:$0xff] %v262_v20 }
 0x131   : > { %504 = shalt.err (!%p501_p10)
}
 0x132   : > { %387 = dma.vmem_to_hbm [thread:$0]  (%p623_p4), %s279_s11, 128, %s281_s18, %s265_s19  }
 0x133 PF: > { %p393_p11 = scmp.ge.s32.totalorder %s557_s17, 2  ;;  %s292_s26 = sand.u32 1, %s537_s12  }
 0x134   : > { %s293_s28 = scalar_lea.sflag [#allocation5], %s292_s26 }
 0x135   : > { %p390_p12 = pnand %p393_p11, %p630_p8 }
 0x137   : > { %p391_p13 = pneg %p390_p12 }
 0x139   : > { %532 = dma.done.wait (%p391_p13), %s293_s28, 128  }
 0x13a   : > { %534 = vsyncadd (%p391_p13), %s293_s28, 4294967168  ;;  %s16_s17 = sadd.s32 1, %s557_s17   ;;  %s711_s12 = smov %s541_s13 }
 0x13b   : > { %p13_p0 = scmp.ge.s32.totalorder %s16_s17, 4   ;;  %s712_s13 = smov %s545_s14 }
 0x13c   : > { %s713_s14 = smov %s636_s25  ;;  %s714_s15 = smov %s553_s16 }
 0x13d   : > { %s715_s16 = smov %s717_s20  ;;  %15 = sbr.rel (!%p13_p0) target bundleno = 4 (0x4), region = 86 }
 0x142   :  { %299 = vsyncpa [#allocation5], 1 }
 0x143   :  { %301 = vsyncpa [#allocation5 + $0x1], 1 }
 0x144   :  { %302 = vsyncmov [#allocation3] }
 0x147   :  { %s303_s22 = vpop.sfrf %302 }
 0x148   :  { %p382_p4 = scmp.ne.s32.totalorder %s303_s22, 0 }
 0x14a   :  { %307 = shalt.err (%p382_p4)  }
 0x14b   :  { %309 = vsyncmov [#allocation3 + $0x1] }
 0x14e   :  { %s310_s24 = vpop.sfrf %309 }
 0x14f   :  { %p383_p8 = scmp.ne.s32.totalorder %s310_s24, 0 }
 0x151   :  { %314 = shalt.err (%p383_p8)  }

</bundles_post_ra>
